<compile_context>
chip_gen: v6e
topology: v6e:2x2x1
jax: 0.10.0
libtpu: 0.0.40
codegen_flags: <defaults>
</compile_context>

<pallas_src>
import functools

import jax
import jax.numpy as jnp
from jax.experimental import pallas as pl
from jax.experimental.pallas import tpu as pltpu


def _bilinear_matrix(out_size: int, in_size: int) -> jnp.ndarray:
    """Row-stochastic (out_size, in_size) bilinear interpolation matrix
    (half-pixel / align_corners=False convention, matching F.interpolate)."""
    if out_size == in_size:
        return jnp.eye(out_size, dtype=jnp.float32)
    scale = in_size / out_size
    dst = jnp.arange(out_size, dtype=jnp.float32)
    src = (dst + 0.5) * scale - 0.5
    src = jnp.clip(src, 0.0, float(in_size - 1))
    lo = jnp.floor(src).astype(jnp.int32)
    hi = jnp.minimum(lo + 1, in_size - 1)
    frac = src - lo.astype(jnp.float32)
    rows = jnp.arange(out_size)
    m = jnp.zeros((out_size, in_size), jnp.float32)
    m = m.at[rows, lo].add(1.0 - frac)
    m = m.at[rows, hi].add(frac)
    return m


@functools.lru_cache(maxsize=None)
def _interp_matrices(h_in, w_in, c, h_out, w_out, fuse_wide):
    """bf16 interpolation matrices; 1/255 is folded into the height matrix."""
    wh = (_bilinear_matrix(h_out, h_in) * (1.0 / 255.0)).astype(jnp.bfloat16)
    ww = _bilinear_matrix(w_out, w_in)                     # (w_out, w_in) f32
    eye_c = jnp.eye(c, dtype=jnp.float32)
    if fuse_wide:
        # wwc[wi*C + cc, ch*W_out + v] = ww[v, wi] * (cc == ch)
        wwc = (ww.T[:, None, None, :] * eye_c[None, :, :, None]
               ).reshape(w_in * c, c * w_out)
    else:
        # wwc[ch, wi*C + cc, v] = ww[v, wi] * (cc == ch)
        wwc = (ww.T[None, :, None, :] * eye_c[:, None, :, None]
               ).reshape(c, w_in * c, w_out)
    return wh, wwc.astype(jnp.bfloat16)


def _resize_norm_kernel(x_ref, wh_ref, wwc_ref, o_ref, *,
                        wblk_c, num_wb, fuse_wide):
    # x_ref  : (H_in, wblk_c)          one width-chunk of one frame (HWC lanes)
    # wh_ref : (H_out, H_in)   bf16    height interp, 1/255 pre-folded (resident)
    # wwc_ref: fused -> (W_in*C, C*W_out) bf16   width interp + CHW de-interleave
    #          else  -> (C, W_in*C, W_out) bf16  (both fully resident)
    # o_ref  : (C, H_out, W_out) f32   revisited/accumulated across the w axis
    n_ch, h_out, w_out = o_ref.shape
    accumulate = num_wb > 1

    if accumulate:
        @pl.when(pl.program_id(1) == 0)
        def _init():
            o_ref[...] = jnp.zeros_like(o_ref)

    # bf16 MXU operands, f32 accumulation (pixels 0..255 are exact in bf16).
    frame = x_ref[...].astype(jnp.bfloat16)                 # (H_in, wblk_c)
    tmp = jnp.dot(wh_ref[...], frame,
                  preferred_element_type=jnp.float32)       # (H_out, wblk_c)
    tmp = tmp.astype(jnp.bfloat16)

    def _emit(c, plane):
        if accumulate:
            o_ref[c] += plane
        else:
            o_ref[c] = plane

    if accumulate:
        k0 = pl.multiple_of(pl.program_id(1) * wblk_c, wblk_c)

    if fuse_wide:
        # One wide matmul; channel blocks are lane-aligned (W_out % 128 == 0).
        sel = wwc_ref[pl.ds(k0, wblk_c), :] if accumulate else wwc_ref[...]
        wide = jnp.dot(tmp, sel, preferred_element_type=jnp.float32)
        for c in range(n_ch):
            _emit(c, wide[:, c * w_out:(c + 1) * w_out])
    else:
        for c in range(n_ch):
            sel = (wwc_ref[c, pl.ds(k0, wblk_c), :] if accumulate
                   else wwc_ref[c])
            _emit(c, jnp.dot(tmp, sel, preferred_element_type=jnp.float32))


def _pick_w_block(h_in, w_in, c, itemsize, budget_bytes=4 * 1024 * 1024):
    """Largest width chunk whose (H_in, W_blk*C) frame block fits the budget
    and whose lane extent W_blk*C is a multiple of 128.  Falls back to the
    whole width (small frames, or no aligned divisor)."""
    if h_in * w_in * c * itemsize <= budget_bytes:
        return w_in
    for w_blk in range(w_in, 0, -1):
        if w_in % w_blk:
            continue
        if (w_blk * c) % 128:
            continue
        if h_in * w_blk * c * itemsize <= budget_bytes:
            return w_blk
    return w_in


def _build_call(T, H_in, W_in, C, H_out, W_out, wblk, num_wb, fuse_wide,
                x_itemsize, single_buffer_resident):
    WC = W_in * C
    wblk_c = wblk * C
    kernel = functools.partial(_resize_norm_kernel, wblk_c=wblk_c,
                               num_wb=num_wb, fuse_wide=fuse_wide)

    res_kw = {}
    if single_buffer_resident:
        # Resident matrices (constant index_map) don't need double-buffering.
        res_kw = dict(pipeline_mode=pl.Buffered(1))
    wh_spec = pl.BlockSpec((H_out, H_in), lambda t, w: (0, 0), **res_kw)
    if fuse_wide:
        wwc_spec = pl.BlockSpec((WC, C * W_out), lambda t, w: (0, 0), **res_kw)
    else:
        wwc_spec = pl.BlockSpec((C, WC, W_out), lambda t, w: (0, 0, 0), **res_kw)

    # Rough VMEM plan (x2 for pipelined operands), used to size the scoped limit.
    vmem_needed = (2 * H_in * wblk_c * x_itemsize          # frame blocks
                   + 2 * H_out * H_in * 2                  # wh
                   + 2 * WC * C * W_out * 2                # wwc
                   + 2 * C * H_out * W_out * 4             # output block
                   + H_out * wblk_c * (4 + 2)              # tmp f32 + bf16
                   + H_out * C * W_out * 4)                # wide (fused path)
    vmem_limit = int(min(max(2 * vmem_needed, 32 * 1024 * 1024),
                         64 * 1024 * 1024))

    flops = 2 * T * H_out * WC * (H_in + C * W_out)
    bytes_accessed = (T * H_in * WC * x_itemsize
                      + H_out * H_in * 2 + WC * C * W_out * 2
                      + T * C * H_out * W_out * 4)

    call = pl.pallas_call(
        kernel,
        out_shape=jax.ShapeDtypeStruct((T, C, H_out, W_out), jnp.float32),
        grid_spec=pltpu.PrefetchScalarGridSpec(
            num_scalar_prefetch=0,
            grid=(T, num_wb),            # frames parallel, width chunks last
            in_specs=[
                pl.BlockSpec((pl.Squeezed(), H_in, wblk_c),
                             lambda t, w: (t, 0, w)),
                wh_spec,
                wwc_spec,
            ],
            out_specs=pl.BlockSpec((pl.Squeezed(), C, H_out, W_out),
                                   lambda t, w: (t, 0, 0, 0)),
        ),
        compiler_params=pltpu.CompilerParams(
            dimension_semantics=("parallel", "arbitrary"),
            vmem_limit_bytes=vmem_limit),
        cost_estimate=pl.CostEstimate(flops=int(flops), transcendentals=0,
                                      bytes_accessed=int(bytes_accessed)),
    )
    return jax.jit(call)


_COMPILED = {}


def resize_normalize(video_hwc, size, w_block=None):
    """video_hwc: (T, H_in, W_in, C), pixel values in [0, 255].
    Pass uint8 / bfloat16 to minimise HBM read bytes (the kernel casts to bf16
    MXU operands internally); no wrapper-side cast is performed.
    Returns (T, C, H_out, W_out) float32 in [0, 1]."""
    T, H_in, W_in, C = video_hwc.shape
    H_out, W_out = size
    itemsize = jnp.dtype(video_hwc.dtype).itemsize

    if w_block is None:
        w_block = _pick_w_block(H_in, W_in, C, itemsize)
    assert W_in % w_block == 0, "w_block must divide W_in"
    num_wb = W_in // w_block
    assert num_wb == 1 or (w_block * C) % 128 == 0, \
        "tiled width chunks must be lane aligned (W_blk*C % 128 == 0)"
    fuse_wide = (W_out % 128 == 0)

    # Free, contiguous reshape — no HBM transpose before the kernel.
    x = video_hwc.reshape(T, H_in, W_in * C)
    wh, wwc = _interp_matrices(H_in, W_in, C, H_out, W_out, fuse_wide)

    key = (T, H_in, W_in, C, H_out, W_out, w_block, fuse_wide, itemsize)
    fn = _COMPILED.get(key)
    if fn is not None:
        return fn(x, wh, wwc)

    err = None
    for single_buffer in (True, False):
        try:
            cand = _build_call(T, H_in, W_in, C, H_out, W_out, w_block, num_wb,
                               fuse_wide, itemsize, single_buffer)
            out = jax.block_until_ready(cand(x, wh, wwc))
            _COMPILED[key] = cand
            return out
        except Exception as e:  # pipeline_mode=pl.Buffered(1) unsupported, etc.
            err = e
    raise err


def _reference(video_hwc, size):
    """Pure-JAX exact-f32 reference (standard, non-antialiased bilinear)."""
    wh = _bilinear_matrix(size[0], video_hwc.shape[1])
    ww = _bilinear_matrix(size[1], video_hwc.shape[2])
    x = jnp.transpose(video_hwc, (0, 3, 1, 2)).astype(jnp.float32)
    y = jnp.einsum('oh,tchw->tcow', wh, x)
    y = jnp.einsum('vw,tcow->tcov', ww, y)
    return y / 255.0


if __name__ == "__main__":
    key = jax.random.PRNGKey(0)
    k1, k2, k3 = jax.random.split(key, 3)
    TOL = 2e-2   # bf16 MXU operands -> <= ~6e-3 abs error for values in [0, 1]

    def _check(video, size, w_block=None):
        out = jax.block_until_ready(resize_normalize(video, size, w_block))
        ref = _reference(video, size)
        T, _, _, C = video.shape
        assert out.shape == (T, C, size[0], size[1]), out.shape
        assert out.dtype == jnp.float32
        err = float(jnp.max(jnp.abs(out - ref)))
        assert err < TOL, err

    # 1) Small case: whole-frame block (num_wb=1), per-channel width matmuls.
    video = jax.random.randint(k1, (4, 16, 16, 3), 0, 256,
                               dtype=jnp.int32).astype(jnp.bfloat16)
    _check(video, (8, 8))

    # 2) Lane-tiled + fused wide matmul (W_out % 128 == 0): grid=(T, 2),
    #    output accumulated across width chunks.
    video2 = jax.random.randint(k2, (2, 16, 256, 1), 0, 256,
                                dtype=jnp.int32).astype(jnp.bfloat16)
    _check(video2, (8, 128), w_block=128)

    # 3) Lane-tiled + per-channel path (W_out not a multiple of 128).
    video3 = jax.random.randint(k3, (2, 16, 128, 2), 0, 256,
                                dtype=jnp.int32).astype(jnp.bfloat16)
    _check(video3, (8, 48), w_block=64)

    print("KERNEL_OK")
</pallas_src>

<mosaic_0001>
module attributes {stable_mosaic.version = 11 : i64} {
  func.func @_resize_norm_kernel(%arg0: i32, %arg1: i32, %arg2: memref<1x16x48xbf16, #tpu.memory_space<vmem>>, %arg3: memref<8x16xbf16, #tpu.memory_space<vmem>>, %arg4: memref<3x48x8xbf16, #tpu.memory_space<vmem>>, %arg5: memref<1x3x8x8xf32, #tpu.memory_space<vmem>>) attributes {dimension_semantics = [#tpu.dimension_semantics<parallel>, #tpu.dimension_semantics<arbitrary>], iteration_bounds = array<i64: 4, 1>, scalar_prefetch = 0 : i64, scratch_operands = 0 : i64, tpu.core_type = #tpu.core_type<tc>, window_params = [{transform_indices = @transform_0, window_bounds = array<i64: 1, 16, 48>}, {pipeline_mode = #tpu.pipeline_mode<synchronous>, transform_indices = @transform_1, window_bounds = array<i64: 8, 16>}, {pipeline_mode = #tpu.pipeline_mode<synchronous>, transform_indices = @transform_2, window_bounds = array<i64: 3, 48, 8>}, {transform_indices = @transform_3, window_bounds = array<i64: 1, 3, 8, 8>}]} {
    %c0 = arith.constant 0 : index
    %c0_0 = arith.constant 0 : index
    %c0_1 = arith.constant 0 : index
    %0 = vector.load %arg2[%c0, %c0_0, %c0_1] : memref<1x16x48xbf16, #tpu.memory_space<vmem>>, vector<1x16x48xbf16>
    %1 = vector.shape_cast %0 : vector<1x16x48xbf16> to vector<16x48xbf16>
    %c0_2 = arith.constant 0 : index
    %c0_3 = arith.constant 0 : index
    %2 = vector.load %arg3[%c0_2, %c0_3] : memref<8x16xbf16, #tpu.memory_space<vmem>>, vector<8x16xbf16>
    %cst = arith.constant dense<0.000000e+00> : vector<8x48xf32>
    %3 = tpu.matmul %2, %1, %cst {dimension_numbers = #tpu.dot_dimension_numbers<[1], [0], [0], [1], [0, 0, 1, 1], [], []>} : vector<8x16xbf16>, vector<16x48xbf16>, vector<8x48xf32> -> vector<8x48xf32>
    %4 = arith.truncf %3 : vector<8x48xf32> to vector<8x48xbf16>
    %c0_4 = arith.constant 0 : index
    %c0_5 = arith.constant 0 : index
    %c0_6 = arith.constant 0 : index
    %5 = vector.load %arg4[%c0_4, %c0_5, %c0_6] : memref<3x48x8xbf16, #tpu.memory_space<vmem>>, vector<1x48x8xbf16>
    %6 = vector.shape_cast %5 : vector<1x48x8xbf16> to vector<48x8xbf16>
    %cst_7 = arith.constant dense<0.000000e+00> : vector<8x8xf32>
    %7 = tpu.matmul %4, %6, %cst_7 {dimension_numbers = #tpu.dot_dimension_numbers<[1], [0], [0], [1], [0, 0, 1, 1], [], []>} : vector<8x48xbf16>, vector<48x8xbf16>, vector<8x8xf32> -> vector<8x8xf32>
    %c0_8 = arith.constant 0 : index
    %c0_9 = arith.constant 0 : index
    %c0_10 = arith.constant 0 : index
    %c0_11 = arith.constant 0 : index
    %8 = vector.load %arg5[%c0_8, %c0_9, %c0_10, %c0_11] : memref<1x3x8x8xf32, #tpu.memory_space<vmem>>, vector<1x1x8x8xf32>
    %9 = vector.shape_cast %8 : vector<1x1x8x8xf32> to vector<8x8xf32>
    %10 = vector.shape_cast %7 : vector<8x8xf32> to vector<1x1x8x8xf32>
    tpu.vector_store %arg5[%c0_8, %c0_9, %c0_10, %c0_11], %10 {strides = array<i32>} : memref<1x3x8x8xf32, #tpu.memory_space<vmem>>, vector<1x1x8x8xf32>,
    %c1 = arith.constant 1 : index
    %c0_12 = arith.constant 0 : index
    %c0_13 = arith.constant 0 : index
    %11 = vector.load %arg4[%c1, %c0_12, %c0_13] : memref<3x48x8xbf16, #tpu.memory_space<vmem>>, vector<1x48x8xbf16>
    %12 = vector.shape_cast %11 : vector<1x48x8xbf16> to vector<48x8xbf16>
    %cst_14 = arith.constant dense<0.000000e+00> : vector<8x8xf32>
    %13 = tpu.matmul %4, %12, %cst_14 {dimension_numbers = #tpu.dot_dimension_numbers<[1], [0], [0], [1], [0, 0, 1, 1], [], []>} : vector<8x48xbf16>, vector<48x8xbf16>, vector<8x8xf32> -> vector<8x8xf32>
    %c0_15 = arith.constant 0 : index
    %c1_16 = arith.constant 1 : index
    %c0_17 = arith.constant 0 : index
    %c0_18 = arith.constant 0 : index
    %14 = vector.load %arg5[%c0_15, %c1_16, %c0_17, %c0_18] : memref<1x3x8x8xf32, #tpu.memory_space<vmem>>, vector<1x1x8x8xf32>
    %15 = vector.shape_cast %14 : vector<1x1x8x8xf32> to vector<8x8xf32>
    %16 = vector.shape_cast %13 : vector<8x8xf32> to vector<1x1x8x8xf32>
    tpu.vector_store %arg5[%c0_15, %c1_16, %c0_17, %c0_18], %16 {strides = array<i32>} : memref<1x3x8x8xf32, #tpu.memory_space<vmem>>, vector<1x1x8x8xf32>,
    %c2 = arith.constant 2 : index
    %c0_19 = arith.constant 0 : index
    %c0_20 = arith.constant 0 : index
    %17 = vector.load %arg4[%c2, %c0_19, %c0_20] : memref<3x48x8xbf16, #tpu.memory_space<vmem>>, vector<1x48x8xbf16>
    %18 = vector.shape_cast %17 : vector<1x48x8xbf16> to vector<48x8xbf16>
    %cst_21 = arith.constant dense<0.000000e+00> : vector<8x8xf32>
    %19 = tpu.matmul %4, %18, %cst_21 {dimension_numbers = #tpu.dot_dimension_numbers<[1], [0], [0], [1], [0, 0, 1, 1], [], []>} : vector<8x48xbf16>, vector<48x8xbf16>, vector<8x8xf32> -> vector<8x8xf32>
    %c0_22 = arith.constant 0 : index
    %c2_23 = arith.constant 2 : index
    %c0_24 = arith.constant 0 : index
    %c0_25 = arith.constant 0 : index
    %20 = vector.load %arg5[%c0_22, %c2_23, %c0_24, %c0_25] : memref<1x3x8x8xf32, #tpu.memory_space<vmem>>, vector<1x1x8x8xf32>
    %21 = vector.shape_cast %20 : vector<1x1x8x8xf32> to vector<8x8xf32>
    %22 = vector.shape_cast %19 : vector<8x8xf32> to vector<1x1x8x8xf32>
    tpu.vector_store %arg5[%c0_22, %c2_23, %c0_24, %c0_25], %22 {strides = array<i32>} : memref<1x3x8x8xf32, #tpu.memory_space<vmem>>, vector<1x1x8x8xf32>,
    return
  }
  func.func @transform_0(%arg0: i32, %arg1: i32) -> (i32, i32, i32) {
    %c0_i32 = arith.constant 0 : i32
    %c0_i32_0 = arith.constant 0 : i32
    return %arg0, %c0_i32, %arg1 : i32, i32, i32
  }
  func.func @transform_1(%arg0: i32, %arg1: i32) -> (i32, i32) {
    %c0_i32 = arith.constant 0 : i32
    %c0_i32_0 = arith.constant 0 : i32
    %c0_i32_1 = arith.constant 0 : i32
    return %c0_i32, %c0_i32_0 : i32, i32
  }
  func.func @transform_2(%arg0: i32, %arg1: i32) -> (i32, i32, i32) {
    %c0_i32 = arith.constant 0 : i32
    %c0_i32_0 = arith.constant 0 : i32
    %c0_i32_1 = arith.constant 0 : i32
    %c0_i32_2 = arith.constant 0 : i32
    return %c0_i32, %c0_i32_0, %c0_i32_1 : i32, i32, i32
  }
  func.func @transform_3(%arg0: i32, %arg1: i32) -> (i32, i32, i32, i32) {
    %c0_i32 = arith.constant 0 : i32
    %c0_i32_0 = arith.constant 0 : i32
    %c0_i32_1 = arith.constant 0 : i32
    %c0_i32_2 = arith.constant 0 : i32
    return %arg0, %c0_i32, %c0_i32_0, %c0_i32_1 : i32, i32, i32, i32
  }
}

module attributes {stable_mosaic.version = 11 : i64} {
  func.func @_resize_norm_kernel(%arg0: i32, %arg1: i32, %arg2: memref<1x16x48xbf16, #tpu.memory_space<vmem>>, %arg3: memref<8x16xbf16, #tpu.memory_space<vmem>>, %arg4: memref<3x48x8xbf16, #tpu.memory_space<vmem>>, %arg5: memref<1x3x8x8xf32, #tpu.memory_space<vmem>>) attributes {dimension_semantics = [#tpu.dimension_semantics<parallel>, #tpu.dimension_semantics<arbitrary>], iteration_bounds = array<i64: 4, 1>, scalar_prefetch = 0 : i64, scratch_operands = 0 : i64, tpu.core_type = #tpu.core_type<tc>, window_params = [{transform_indices = @transform_0, window_bounds = array<i64: 1, 16, 48>}, {pipeline_mode = #tpu.pipeline_mode<synchronous>, transform_indices = @transform_1, window_bounds = array<i64: 8, 16>}, {pipeline_mode = #tpu.pipeline_mode<synchronous>, transform_indices = @transform_2, window_bounds = array<i64: 3, 48, 8>}, {transform_indices = @transform_3, window_bounds = array<i64: 1, 3, 8, 8>}]} {
    %c0 = arith.constant 0 : index
    %c0_0 = arith.constant 0 : index
    %c0_1 = arith.constant 0 : index
    %0 = vector.load %arg2[%c0, %c0_0, %c0_1] : memref<1x16x48xbf16, #tpu.memory_space<vmem>>, vector<1x16x48xbf16>
    %1 = vector.shape_cast %0 : vector<1x16x48xbf16> to vector<16x48xbf16>
    %c0_2 = arith.constant 0 : index
    %c0_3 = arith.constant 0 : index
    %2 = vector.load %arg3[%c0_2, %c0_3] : memref<8x16xbf16, #tpu.memory_space<vmem>>, vector<8x16xbf16>
    %cst = arith.constant dense<0.000000e+00> : vector<8x48xf32>
    %3 = tpu.matmul %2, %1, %cst {dimension_numbers = #tpu.dot_dimension_numbers<[1], [0], [0], [1], [0, 0, 1, 1], [], []>} : vector<8x16xbf16>, vector<16x48xbf16>, vector<8x48xf32> -> vector<8x48xf32>
    %4 = arith.truncf %3 : vector<8x48xf32> to vector<8x48xbf16>
    %c0_4 = arith.constant 0 : index
    %c0_5 = arith.constant 0 : index
    %c0_6 = arith.constant 0 : index
    %5 = vector.load %arg4[%c0_4, %c0_5, %c0_6] : memref<3x48x8xbf16, #tpu.memory_space<vmem>>, vector<1x48x8xbf16>
    %6 = vector.shape_cast %5 : vector<1x48x8xbf16> to vector<48x8xbf16>
    %cst_7 = arith.constant dense<0.000000e+00> : vector<8x8xf32>
    %7 = tpu.matmul %4, %6, %cst_7 {dimension_numbers = #tpu.dot_dimension_numbers<[1], [0], [0], [1], [0, 0, 1, 1], [], []>} : vector<8x48xbf16>, vector<48x8xbf16>, vector<8x8xf32> -> vector<8x8xf32>
    %c0_8 = arith.constant 0 : index
    %c0_9 = arith.constant 0 : index
    %c0_10 = arith.constant 0 : index
    %c0_11 = arith.constant 0 : index
    %8 = vector.load %arg5[%c0_8, %c0_9, %c0_10, %c0_11] : memref<1x3x8x8xf32, #tpu.memory_space<vmem>>, vector<1x1x8x8xf32>
    %9 = vector.shape_cast %8 : vector<1x1x8x8xf32> to vector<8x8xf32>
    %10 = vector.shape_cast %7 : vector<8x8xf32> to vector<1x1x8x8xf32>
    tpu.vector_store %arg5[%c0_8, %c0_9, %c0_10, %c0_11], %10 {strides = array<i32>} : memref<1x3x8x8xf32, #tpu.memory_space<vmem>>, vector<1x1x8x8xf32>,
    %c1 = arith.constant 1 : index
    %c0_12 = arith.constant 0 : index
    %c0_13 = arith.constant 0 : index
    %11 = vector.load %arg4[%c1, %c0_12, %c0_13] : memref<3x48x8xbf16, #tpu.memory_space<vmem>>, vector<1x48x8xbf16>
    %12 = vector.shape_cast %11 : vector<1x48x8xbf16> to vector<48x8xbf16>
    %cst_14 = arith.constant dense<0.000000e+00> : vector<8x8xf32>
    %13 = tpu.matmul %4, %12, %cst_14 {dimension_numbers = #tpu.dot_dimension_numbers<[1], [0], [0], [1], [0, 0, 1, 1], [], []>} : vector<8x48xbf16>, vector<48x8xbf16>, vector<8x8xf32> -> vector<8x8xf32>
    %c0_15 = arith.constant 0 : index
    %c1_16 = arith.constant 1 : index
    %c0_17 = arith.constant 0 : index
    %c0_18 = arith.constant 0 : index
    %14 = vector.load %arg5[%c0_15, %c1_16, %c0_17, %c0_18] : memref<1x3x8x8xf32, #tpu.memory_space<vmem>>, vector<1x1x8x8xf32>
    %15 = vector.shape_cast %14 : vector<1x1x8x8xf32> to vector<8x8xf32>
    %16 = vector.shape_cast %13 : vector<8x8xf32> to vector<1x1x8x8xf32>
    tpu.vector_store %arg5[%c0_15, %c1_16, %c0_17, %c0_18], %16 {strides = array<i32>} : memref<1x3x8x8xf32, #tpu.memory_space<vmem>>, vector<1x1x8x8xf32>,
    %c2 = arith.constant 2 : index
    %c0_19 = arith.constant 0 : index
    %c0_20 = arith.constant 0 : index
    %17 = vector.load %arg4[%c2, %c0_19, %c0_20] : memref<3x48x8xbf16, #tpu.memory_space<vmem>>, vector<1x48x8xbf16>
    %18 = vector.shape_cast %17 : vector<1x48x8xbf16> to vector<48x8xbf16>
    %cst_21 = arith.constant dense<0.000000e+00> : vector<8x8xf32>
    %19 = tpu.matmul %4, %18, %cst_21 {dimension_numbers = #tpu.dot_dimension_numbers<[1], [0], [0], [1], [0, 0, 1, 1], [], []>} : vector<8x48xbf16>, vector<48x8xbf16>, vector<8x8xf32> -> vector<8x8xf32>
    %c0_22 = arith.constant 0 : index
    %c2_23 = arith.constant 2 : index
    %c0_24 = arith.constant 0 : index
    %c0_25 = arith.constant 0 : index
    %20 = vector.load %arg5[%c0_22, %c2_23, %c0_24, %c0_25] : memref<1x3x8x8xf32, #tpu.memory_space<vmem>>, vector<1x1x8x8xf32>
    %21 = vector.shape_cast %20 : vector<1x1x8x8xf32> to vector<8x8xf32>
    %22 = vector.shape_cast %19 : vector<8x8xf32> to vector<1x1x8x8xf32>
    tpu.vector_store %arg5[%c0_22, %c2_23, %c0_24, %c0_25], %22 {strides = array<i32>} : memref<1x3x8x8xf32, #tpu.memory_space<vmem>>, vector<1x1x8x8xf32>,
    return
  }
  func.func @transform_0(%arg0: i32, %arg1: i32) -> (i32, i32, i32) {
    %c0_i32 = arith.constant 0 : i32
    %c0_i32_0 = arith.constant 0 : i32
    return %arg0, %c0_i32, %arg1 : i32, i32, i32
  }
  func.func @transform_1(%arg0: i32, %arg1: i32) -> (i32, i32) {
    %c0_i32 = arith.constant 0 : i32
    %c0_i32_0 = arith.constant 0 : i32
    %c0_i32_1 = arith.constant 0 : i32
    return %c0_i32, %c0_i32_0 : i32, i32
  }
  func.func @transform_2(%arg0: i32, %arg1: i32) -> (i32, i32, i32) {
    %c0_i32 = arith.constant 0 : i32
    %c0_i32_0 = arith.constant 0 : i32
    %c0_i32_1 = arith.constant 0 : i32
    %c0_i32_2 = arith.constant 0 : i32
    return %c0_i32, %c0_i32_0, %c0_i32_1 : i32, i32, i32
  }
  func.func @transform_3(%arg0: i32, %arg1: i32) -> (i32, i32, i32, i32) {
    %c0_i32 = arith.constant 0 : i32
    %c0_i32_0 = arith.constant 0 : i32
    %c0_i32_1 = arith.constant 0 : i32
    %c0_i32_2 = arith.constant 0 : i32
    return %arg0, %c0_i32, %c0_i32_0, %c0_i32_1 : i32, i32, i32, i32
  }
}

</mosaic_0001>

<bundles_post_ra>
// kernel: tpu_custom_call.1
= control target key start
LH: loop header
LB: loop body
LE: loop exit
PB: predicated region body
PF: predicated region fallthrough
CT: control target
= control target key end

     0   :  { %8 = vsyncpa [#allocation3], 0  ;;  %s958_s0 = inlined_call_operand.vmem [shape: bf16[4,16,48], index: 0, kind: input, shape index: {}]   ;;  %s959_s1 = inlined_call_operand.vmem [shape: bf16[8,16], index: 1, kind: input, shape index: {}]   ;;  %s960_s2 = inlined_call_operand.vmem [shape: bf16[3,48,8], index: 2, kind: input, shape index: {}]   ;;  %s961_s3 = inlined_call_operand.hbm [shape: f32[4,3,8,8], index: 3, kind: output, shape index: {}]  }
   0x1   :  { %10 = vsyncpa [#allocation3 + $0x1], 0  ;;  %s804_s12 = smov 0   ;;  %s806_s13 = smov 0  }
   0x2   :  { %s808_s14 = smov 0   ;;  %s810_s15 = smov 0  }
   0x3   :  { %s812_s16 = smov 0   ;;  %s814_s17 = smov 0  }
   0x4 LB: > { %s541_s18 = sadd.s32 4294967295, %s777_s17   ;;  %s542_s19 = sadd.s32 4294967294, %s777_s17   ;;  %s777_s17 = sphi %s814_s17, %s16_s17   ;;  %s773_s16 = sphi %s812_s16, %s968_s16   ;;  %s769_s15 = sphi %s810_s15, %s967_s15   ;;  %s765_s14 = sphi %s808_s14, %s966_s14   ;;  %s761_s13 = sphi %s806_s13, %s965_s13   ;;  %s757_s12 = sphi %s804_s12, %s964_s12  }
   0x5   : > { %s28_s20 = sadd.s32 1, %s773_s16  ;;  %s105_s21 = sadd.s32 1, %s765_s14 }
   0x6   : > { %p30_p0 = scmp.ge.s32.totalorder %s28_s20, 4  ;;  %p115_p1 = scmp.ne.s32.totalorder %s765_s14, %s761_s13 }
   0x7   : > { %p116_p2 = scmp.eq.s32.totalorder %s541_s18, 3  ;;  %p121_p3 = scmp.ne.s32.totalorder %s761_s13, %s757_s12 }
   0x8   : > { %s970_s20 = smov (%p30_p0, %s28_s20), 0  ;;  %p122_p5 = scmp.eq.s32.totalorder %s542_s19, 3 }
   0x9   : > { %p844_p4 = por %p116_p2, %p115_p1  ;;  %s102_s23 = ssub.s32 %s773_s16, %s970_s20 }
   0xa   : > { %p545_p6 = scmp.ge.s32.totalorder %s777_s17, 1  ;;  %p103_p7 = scmp.eq.s32.totalorder %s102_s23, 0 }
   0xb   : > { %p851_p8 = por %p122_p5, %p121_p3  ;;  %p157_p9 = scmp.lt.s32.totalorder %s777_s17, 5 }
   0xc   : > { %s857_s25 = scalar_select %p103_p7, %s765_s14, %s105_s21  }
   0xd   : > { %p158_p10 = pnand %p545_p6, %p157_p9 }
   0xe   : > { %p184_p11 = scmp.lt.s32.totalorder (!%p158_p10), %s769_s15, 3  ;;  %s631_s10 = smul.u32 (!%p158_p10), 384, %s769_s15 }
   0xf   : > { %161 = sbr.rel (%p158_p10) target bundleno = 444 (0x1bc), region = 32 }
  0x10   : > { %s910_s21 = scalar_lea.hbm (!%p158_p10), %s961_s3, %s631_s10 }
  0x14   : > { %v779_v0 = vmov 0.0   ;;  %vm780_vm0 = vmmov 0   ;;  %v692_v1 = vld [vmem:[%s960_s2 + $0x10] sm:$0xff]   ;;  %s185_s28 = scalar_select %p184_p11, %s769_s15, 3  ;;  %v694_v2 = vld [vmem:[%s960_s2 + $0x8] sm:$0xff]   ;;  %v696_v3 = vld [vmem:[%s960_s2] sm:$0xff]  }
  0x15   : > { %594 = vmatprep.subr.bf16.mxu0 %v779_v0  ;;  %596 = vmatprep.mubr.msk.bf16.mxu0 %vm780_vm0, %v779_v0  ;;  %v195_v5 = vld [vmem:[%s959_s1] sm:$0xf]  ;;  %vm202_vm1 = vcmask 130048   ;;  %v693_v6 = vld [vmem:[%s960_s2 + $0x28] sm:$0xff]   ;;  %v697_v8 = vld [vmem:[%s960_s2 + $0x18] sm:$0xff]   ;;  %vm271_vm2 = vcmask 392192  }
  0x16   : > { %600 = vmatprep.subr.bf16.mxu1 %v779_v0  ;;  %606 = vmatprep.mubr.msk.bf16.mxu1 %vm780_vm0, %v779_v0  ;;  %s579_s4 = sshll.u32 %s185_s28, 3  ;;  %v695_v7 = vld [vmem:[%s960_s2 + $0x20] sm:$0xff]   ;;  %v699_v14 = vld [vmem:[%s960_s2 + $0x38] sm:$0xff]   ;;  %v700_v16 = vld [vmem:[%s960_s2 + $0x30] sm:$0xff]   ;;  %vm315_vm3 = vcmask 64512   ;;  %s781_s15 = smov [#allocation2]  }
  0x17   : > { %601 = vmatpush3.bf16.msra.mxu1 %v692_v1  ;;  %s191_s7 = scalar_lea.vmem %s958_s0, %s579_s4  ;;  %v698_v10 = vld [vmem:[%s960_s2 + $0x40] sm:$0xff]   ;;  %s705_s27 = sshll.u32 %s781_s15, 4  ;;  %s706_s27 = int_to_ptr.vmem [resolvable:$false] %s705_s27 }
  0x18   : > { %602 = vmatprep.subr.bf16.mxu1 %v779_v0  ;;  %v691_v4 = vld [vmem:[%s191_s7] sm:$0xff]   ;;  %s181_s7 = sand.u32 1, %s761_s13   ;;  %s707_s28 = scalar_lea.vmem %s706_s27, 768 }
  0x19   : > { %595 = vmatpush3.bf16.msra.mxu0 %v691_v4  ;;  %s630_s8 = smul.u32 24, %s181_s7  ;;  %s913_s23 = scalar_lea.sflag [#allocation3], %s181_s7 }
  0x1a   : > { %610 = vmatprep.subr.bf16.mxu0 %v779_v0 }
  0x1b   : > { %603 = vmatpush3.bf16.msra.mxu1 %v694_v2  ;;  %s183_s9 = scalar_lea.vmem [#allocation2], %s630_s8 }
  0x1c   : > { %604 = vmatprep.subr.bf16.mxu1 %v779_v0  ;;  %597 = vmatmul.mubr.msk.bf16.vlgmr.msra.gmra.mxu0 %vm202_vm1, %v195_v5  ;;  %s465_s11 = sshll.u32 %s183_s9, 4  ;;  %s905_s11 = int_to_ptr.vmem [resolvable:$true] %s465_s11 }
  0x1d   : > { %611 = vmatpush3.bf16.msra.mxu0 %v693_v6  ;;  %616 = vmatprep.mubr.msk.bf16.mxu0 %vm780_vm0, %v779_v0  ;;  %s701_s26 = scalar_lea.vmem %s905_s11, 384  ;;  %p708_p1 = scmp.lt.s32.totalorder %s905_s11, %s706_s27 }
  0x1e   : > { %612 = vmatprep.subr.bf16.mxu0 %v779_v0  ;;  %p702_p12 = scmp.ne.s32.totalorder %s905_s11, %s701_s26  ;;  %p709_p2 = scmp.lt.s32.totalorder %s707_s28, %s701_s26 }
  0x1f   : > { %605 = vmatpush3.bf16.msra.mxu1 %v696_v3 }
  0x20   : > { %620 = vmatprep.subr.bf16.mxu1 %v779_v0  ;;  %p703_p13 = pnand %p702_p12, %p844_p4  ;;  %p710_p3 = por %p709_p2, %p708_p1 }
  0x21   : > { %613 = vmatpush3.bf16.msra.mxu0 %v695_v7 }
  0x22   : > { %614 = vmatprep.subr.bf16.mxu0 %v779_v0  ;;  %p704_p0 = pneg %p703_p13 }
  0x24   : > { %p711_p5 = pnand %p710_p3, %p704_p0 }
  0x25   : > { %615 = vmatpush3.bf16.msra.mxu0 %v697_v8 }
  0xdc   : > { %v240_v9 = vpop.f32.mrf.mxu0 }
  0xdd   : > { %v246_v11 = vpack.c.bf16 %v240_v9, %v240_v9 }
  0xde   : > { %v598_v12 = vpop.f32.mrf.mxu0 }
  0xdf   : > { %607 = vmatmul.mubr.msk.bf16.vlgmr.msra.gmra.mxu1 %vm271_vm2, %v246_v11  ;;  %617 = vmatmul.mubr.msk.bf16.vlgmr.msra.gmra.mxu0 %vm271_vm2, %v246_v11 }
  0xe0   : > { %621 = vmatpush3.bf16.msra.mxu1 %v698_v10  ;;  %v243_v13 = vpop.f32.mrf.mxu0  ;;  %626 = vmatprep.mubr.msk.bf16.mxu1 %vm780_vm0, %v779_v0 }
  0xe1   : > { %622 = vmatprep.subr.bf16.mxu1 %v779_v0 }
  0xe2   : > { %v599_v15 = vpop.f32.mrf.mxu0 }
  0xe4   : > { %623 = vmatpush3.bf16.msra.mxu1 %v699_v14 }
  0xe5   : > { %624 = vmatprep.subr.bf16.mxu1 %v779_v0 }
  0xe8   : > { %625 = vmatpush3.bf16.msra.mxu1 %v700_v16 }
  0xeb   : > { %627 = vmatmul.mubr.msk.bf16.vlgmr.msra.gmra.mxu1 %vm271_vm2, %v246_v11 }
 0x19f   : > { %v309_v17 = vpop.f32.mrf.mxu1  ;;  %v376_v18 = vpop.f32.mrf.mxu0 }
 0x1a0   : > { %316 = vst.msk [vmem:[%s183_s9] sm:$0xff] %vm315_vm3, %v309_v17  ;;  %564 = vst.msk [vmem:[%s183_s9 + $0x8] sm:$0xff] %vm315_vm3, %v376_v18 }
 0x1a1   : > { %v608_v19 = vpop.f32.mrf.mxu1  ;;  %v618_v20 = vpop.f32.mrf.mxu0 }
 0x1a3   : > { %v312_v21 = vpop.f32.mrf.mxu1  ;;  %v379_v22 = vpop.f32.mrf.mxu0 }
 0x1a5   : > { %v609_v23 = vpop.f32.mrf.mxu1  ;;  %v619_v24 = vpop.f32.mrf.mxu0 }
 0x1ab   : > { %v443_v25 = vpop.f32.mrf.mxu1 }
 0x1ac   : > { %575 = vst.msk [vmem:[%s183_s9 + $0x10] sm:$0xff] %vm315_vm3, %v443_v25 }
 0x1ad   : > { %v628_v26 = vpop.f32.mrf.mxu1 }
 0x1ae   : > { %714 = shalt.err (!%p711_p5)
}
 0x1af   : > { %s715_s29 = scalar_lea.hbm %s910_s21, 384  ;;  %s719_s5 = scalar_lea.hbm %s961_s3, 1536 }
 0x1b0   : > { %p716_p6 = scmp.ne.s32.totalorder %s910_s21, %s715_s29  ;;  %p720_p10 = scmp.lt.s32.totalorder %s910_s21, %s961_s3 }
 0x1b1   : > { %p721_p11 = scmp.lt.s32.totalorder %s719_s5, %s715_s29 }
 0x1b2   : > { %p717_p7 = pnand %p716_p6, %p844_p4 }
 0x1b3   : > { %p722_p12 = por %p721_p11, %p720_p10 }
 0x1b4   : > { %p718_p9 = pneg %p717_p7 }
 0x1b6   : > { %p723_p13 = pnand %p722_p12, %p718_p9 }
 0x1b8   : > { %726 = shalt.err (!%p723_p13)
}
 0x1b9   : > { %s782_s8 = smov 128   ;;  %s783_s9 = smov 8   ;;  %v446_v27 = vpop.f32.mrf.mxu1 }
 0x1ba   : > { %632 = dma.vmem_to_hbm [thread:$0]  (%p844_p4), %s905_s11, 384, %s910_s21, %s913_s23, %s782_s8, %s782_s8, %s783_s9  }
 0x1bb   : > { %v629_v28 = vpop.f32.mrf.mxu1 }
 0x1bc PF: > { %p638_p0 = scmp.ge.s32.totalorder %s777_s17, 2  ;;  %s480_s10 = sand.u32 1, %s757_s12  }
 0x1bd   : > { %s481_s18 = scalar_lea.sflag [#allocation3], %s480_s10 }
 0x1be   : > { %p635_p1 = pnand %p638_p0, %p851_p8 }
 0x1c0   : > { %p636_p2 = pneg %p635_p1 }
 0x1c2   : > { %752 = dma.done.wait (%p636_p2), %s481_s18, 384  }
 0x1c3   : > { %754 = vsyncadd (%p636_p2), %s481_s18, 4294966912  ;;  %s16_s17 = sadd.s32 1, %s777_s17   ;;  %s964_s12 = smov %s761_s13 }
 0x1c4   : > { %p13_p3 = scmp.ge.s32.totalorder %s16_s17, 6   ;;  %s965_s13 = smov %s765_s14 }
 0x1c5   : > { %s966_s14 = smov %s857_s25  ;;  %s967_s15 = smov %s773_s16 }
 0x1c6   : > { %s968_s16 = smov %s970_s20  ;;  %15 = sbr.rel (!%p13_p3) target bundleno = 4 (0x4), region = 71 }
 0x1cb   :  { %486 = vsyncpa [#allocation3], 1 }
 0x1cc   :  { %488 = vsyncpa [#allocation3 + $0x1], 1 }

// kernel: tpu_custom_call.1
= control target key start
LH: loop header
LB: loop body
LE: loop exit
PB: predicated region body
PF: predicated region fallthrough
CT: control target
= control target key end

     0   :  { %8 = vsyncpa [#allocation3], 0  ;;  %s958_s0 = inlined_call_operand.vmem [shape: bf16[4,16,48], index: 0, kind: input, shape index: {}]   ;;  %s959_s1 = inlined_call_operand.vmem [shape: bf16[8,16], index: 1, kind: input, shape index: {}]   ;;  %s960_s2 = inlined_call_operand.vmem [shape: bf16[3,48,8], index: 2, kind: input, shape index: {}]   ;;  %s961_s3 = inlined_call_operand.hbm [shape: f32[4,3,8,8], index: 3, kind: output, shape index: {}]  }
   0x1   :  { %10 = vsyncpa [#allocation3 + $0x1], 0  ;;  %s804_s12 = smov 0   ;;  %s806_s13 = smov 0  }
   0x2   :  { %s808_s14 = smov 0   ;;  %s810_s15 = smov 0  }
   0x3   :  { %s812_s16 = smov 0   ;;  %s814_s17 = smov 0  }
   0x4 LB: > { %s541_s18 = sadd.s32 4294967295, %s777_s17   ;;  %s542_s19 = sadd.s32 4294967294, %s777_s17   ;;  %s777_s17 = sphi %s814_s17, %s16_s17   ;;  %s773_s16 = sphi %s812_s16, %s968_s16   ;;  %s769_s15 = sphi %s810_s15, %s967_s15   ;;  %s765_s14 = sphi %s808_s14, %s966_s14   ;;  %s761_s13 = sphi %s806_s13, %s965_s13   ;;  %s757_s12 = sphi %s804_s12, %s964_s12  }
   0x5   : > { %s28_s20 = sadd.s32 1, %s773_s16  ;;  %s105_s21 = sadd.s32 1, %s765_s14 }
   0x6   : > { %p30_p0 = scmp.ge.s32.totalorder %s28_s20, 4  ;;  %p115_p1 = scmp.ne.s32.totalorder %s765_s14, %s761_s13 }
   0x7   : > { %p116_p2 = scmp.eq.s32.totalorder %s541_s18, 3  ;;  %p121_p3 = scmp.ne.s32.totalorder %s761_s13, %s757_s12 }
   0x8   : > { %s970_s20 = smov (%p30_p0, %s28_s20), 0  ;;  %p122_p5 = scmp.eq.s32.totalorder %s542_s19, 3 }
   0x9   : > { %p844_p4 = por %p116_p2, %p115_p1  ;;  %s102_s23 = ssub.s32 %s773_s16, %s970_s20 }
   0xa   : > { %p545_p6 = scmp.ge.s32.totalorder %s777_s17, 1  ;;  %p103_p7 = scmp.eq.s32.totalorder %s102_s23, 0 }
   0xb   : > { %p851_p8 = por %p122_p5, %p121_p3  ;;  %p157_p9 = scmp.lt.s32.totalorder %s777_s17, 5 }
   0xc   : > { %s857_s25 = scalar_select %p103_p7, %s765_s14, %s105_s21  }
   0xd   : > { %p158_p10 = pnand %p545_p6, %p157_p9 }
   0xe   : > { %p184_p11 = scmp.lt.s32.totalorder (!%p158_p10), %s769_s15, 3  ;;  %s631_s10 = smul.u32 (!%p158_p10), 384, %s769_s15 }
   0xf   : > { %161 = sbr.rel (%p158_p10) target bundleno = 444 (0x1bc), region = 32 }
  0x10   : > { %s910_s21 = scalar_lea.hbm (!%p158_p10), %s961_s3, %s631_s10 }
  0x14   : > { %v779_v0 = vmov 0.0   ;;  %vm780_vm0 = vmmov 0   ;;  %v692_v1 = vld [vmem:[%s960_s2 + $0x10] sm:$0xff]   ;;  %s185_s28 = scalar_select %p184_p11, %s769_s15, 3  ;;  %v694_v2 = vld [vmem:[%s960_s2 + $0x8] sm:$0xff]   ;;  %v696_v3 = vld [vmem:[%s960_s2] sm:$0xff]  }
  0x15   : > { %594 = vmatprep.subr.bf16.mxu0 %v779_v0  ;;  %596 = vmatprep.mubr.msk.bf16.mxu0 %vm780_vm0, %v779_v0  ;;  %v195_v5 = vld [vmem:[%s959_s1] sm:$0xf]  ;;  %vm202_vm1 = vcmask 130048   ;;  %v693_v6 = vld [vmem:[%s960_s2 + $0x28] sm:$0xff]   ;;  %v697_v8 = vld [vmem:[%s960_s2 + $0x18] sm:$0xff]   ;;  %vm271_vm2 = vcmask 392192  }
  0x16   : > { %600 = vmatprep.subr.bf16.mxu1 %v779_v0  ;;  %606 = vmatprep.mubr.msk.bf16.mxu1 %vm780_vm0, %v779_v0  ;;  %s579_s4 = sshll.u32 %s185_s28, 3  ;;  %v695_v7 = vld [vmem:[%s960_s2 + $0x20] sm:$0xff]   ;;  %v699_v14 = vld [vmem:[%s960_s2 + $0x38] sm:$0xff]   ;;  %v700_v16 = vld [vmem:[%s960_s2 + $0x30] sm:$0xff]   ;;  %vm315_vm3 = vcmask 64512   ;;  %s781_s15 = smov [#allocation2]  }
  0x17   : > { %601 = vmatpush3.bf16.msra.mxu1 %v692_v1  ;;  %s191_s7 = scalar_lea.vmem %s958_s0, %s579_s4  ;;  %v698_v10 = vld [vmem:[%s960_s2 + $0x40] sm:$0xff]   ;;  %s705_s27 = sshll.u32 %s781_s15, 4  ;;  %s706_s27 = int_to_ptr.vmem [resolvable:$false] %s705_s27 }
  0x18   : > { %602 = vmatprep.subr.bf16.mxu1 %v779_v0  ;;  %v691_v4 = vld [vmem:[%s191_s7] sm:$0xff]   ;;  %s181_s7 = sand.u32 1, %s761_s13   ;;  %s707_s28 = scalar_lea.vmem %s706_s27, 768 }
  0x19   : > { %595 = vmatpush3.bf16.msra.mxu0 %v691_v4  ;;  %s630_s8 = smul.u32 24, %s181_s7  ;;  %s913_s23 = scalar_lea.sflag [#allocation3], %s181_s7 }
  0x1a   : > { %610 = vmatprep.subr.bf16.mxu0 %v779_v0 }
  0x1b   : > { %603 = vmatpush3.bf16.msra.mxu1 %v694_v2  ;;  %s183_s9 = scalar_lea.vmem [#allocation2], %s630_s8 }
  0x1c   : > { %604 = vmatprep.subr.bf16.mxu1 %v779_v0  ;;  %597 = vmatmul.mubr.msk.bf16.vlgmr.msra.gmra.mxu0 %vm202_vm1, %v195_v5  ;;  %s465_s11 = sshll.u32 %s183_s9, 4  ;;  %s905_s11 = int_to_ptr.vmem [resolvable:$true] %s465_s11 }
  0x1d   : > { %611 = vmatpush3.bf16.msra.mxu0 %v693_v6  ;;  %616 = vmatprep.mubr.msk.bf16.mxu0 %vm780_vm0, %v779_v0  ;;  %s701_s26 = scalar_lea.vmem %s905_s11, 384  ;;  %p708_p1 = scmp.lt.s32.totalorder %s905_s11, %s706_s27 }
  0x1e   : > { %612 = vmatprep.subr.bf16.mxu0 %v779_v0  ;;  %p702_p12 = scmp.ne.s32.totalorder %s905_s11, %s701_s26  ;;  %p709_p2 = scmp.lt.s32.totalorder %s707_s28, %s701_s26 }
  0x1f   : > { %605 = vmatpush3.bf16.msra.mxu1 %v696_v3 }
  0x20   : > { %620 = vmatprep.subr.bf16.mxu1 %v779_v0  ;;  %p703_p13 = pnand %p702_p12, %p844_p4  ;;  %p710_p3 = por %p709_p2, %p708_p1 }
  0x21   : > { %613 = vmatpush3.bf16.msra.mxu0 %v695_v7 }
  0x22   : > { %614 = vmatprep.subr.bf16.mxu0 %v779_v0  ;;  %p704_p0 = pneg %p703_p13 }
  0x24   : > { %p711_p5 = pnand %p710_p3, %p704_p0 }
  0x25   : > { %615 = vmatpush3.bf16.msra.mxu0 %v697_v8 }
  0xdc   : > { %v240_v9 = vpop.f32.mrf.mxu0 }
  0xdd   : > { %v246_v11 = vpack.c.bf16 %v240_v9, %v240_v9 }
  0xde   : > { %v598_v12 = vpop.f32.mrf.mxu0 }
  0xdf   : > { %607 = vmatmul.mubr.msk.bf16.vlgmr.msra.gmra.mxu1 %vm271_vm2, %v246_v11  ;;  %617 = vmatmul.mubr.msk.bf16.vlgmr.msra.gmra.mxu0 %vm271_vm2, %v246_v11 }
  0xe0   : > { %621 = vmatpush3.bf16.msra.mxu1 %v698_v10  ;;  %v243_v13 = vpop.f32.mrf.mxu0  ;;  %626 = vmatprep.mubr.msk.bf16.mxu1 %vm780_vm0, %v779_v0 }
  0xe1   : > { %622 = vmatprep.subr.bf16.mxu1 %v779_v0 }
  0xe2   : > { %v599_v15 = vpop.f32.mrf.mxu0 }
  0xe4   : > { %623 = vmatpush3.bf16.msra.mxu1 %v699_v14 }
  0xe5   : > { %624 = vmatprep.subr.bf16.mxu1 %v779_v0 }
  0xe8   : > { %625 = vmatpush3.bf16.msra.mxu1 %v700_v16 }
  0xeb   : > { %627 = vmatmul.mubr.msk.bf16.vlgmr.msra.gmra.mxu1 %vm271_vm2, %v246_v11 }
 0x19f   : > { %v309_v17 = vpop.f32.mrf.mxu1  ;;  %v376_v18 = vpop.f32.mrf.mxu0 }
 0x1a0   : > { %316 = vst.msk [vmem:[%s183_s9] sm:$0xff] %vm315_vm3, %v309_v17  ;;  %564 = vst.msk [vmem:[%s183_s9 + $0x8] sm:$0xff] %vm315_vm3, %v376_v18 }
 0x1a1   : > { %v608_v19 = vpop.f32.mrf.mxu1  ;;  %v618_v20 = vpop.f32.mrf.mxu0 }
 0x1a3   : > { %v312_v21 = vpop.f32.mrf.mxu1  ;;  %v379_v22 = vpop.f32.mrf.mxu0 }
 0x1a5   : > { %v609_v23 = vpop.f32.mrf.mxu1  ;;  %v619_v24 = vpop.f32.mrf.mxu0 }
 0x1ab   : > { %v443_v25 = vpop.f32.mrf.mxu1 }
 0x1ac   : > { %575 = vst.msk [vmem:[%s183_s9 + $0x10] sm:$0xff] %vm315_vm3, %v443_v25 }
 0x1ad   : > { %v628_v26 = vpop.f32.mrf.mxu1 }
 0x1ae   : > { %714 = shalt.err (!%p711_p5)
}
 0x1af   : > { %s715_s29 = scalar_lea.hbm %s910_s21, 384  ;;  %s719_s5 = scalar_lea.hbm %s961_s3, 1536 }
 0x1b0   : > { %p716_p6 = scmp.ne.s32.totalorder %s910_s21, %s715_s29  ;;  %p720_p10 = scmp.lt.s32.totalorder %s910_s21, %s961_s3 }
 0x1b1   : > { %p721_p11 = scmp.lt.s32.totalorder %s719_s5, %s715_s29 }
 0x1b2   : > { %p717_p7 = pnand %p716_p6, %p844_p4 }
 0x1b3   : > { %p722_p12 = por %p721_p11, %p720_p10 }
 0x1b4   : > { %p718_p9 = pneg %p717_p7 }
 0x1b6   : > { %p723_p13 = pnand %p722_p12, %p718_p9 }
 0x1b8   : > { %726 = shalt.err (!%p723_p13)
}
 0x1b9   : > { %s782_s8 = smov 128   ;;  %s783_s9 = smov 8   ;;  %v446_v27 = vpop.f32.mrf.mxu1 }
 0x1ba   : > { %632 = dma.vmem_to_hbm [thread:$0]  (%p844_p4), %s905_s11, 384, %s910_s21, %s913_s23, %s782_s8, %s782_s8, %s783_s9  }
 0x1bb   : > { %v629_v28 = vpop.f32.mrf.mxu1 }
 0x1bc PF: > { %p638_p0 = scmp.ge.s32.totalorder %s777_s17, 2  ;;  %s480_s10 = sand.u32 1, %s757_s12  }
 0x1bd   : > { %s481_s18 = scalar_lea.sflag [#allocation3], %s480_s10 }
 0x1be   : > { %p635_p1 = pnand %p638_p0, %p851_p8 }
 0x1c0   : > { %p636_p2 = pneg %p635_p1 }
 0x1c2   : > { %752 = dma.done.wait (%p636_p2), %s481_s18, 384  }
 0x1c3   : > { %754 = vsyncadd (%p636_p2), %s481_s18, 4294966912  ;;  %s16_s17 = sadd.s32 1, %s777_s17   ;;  %s964_s12 = smov %s761_s13 }
 0x1c4   : > { %p13_p3 = scmp.ge.s32.totalorder %s16_s17, 6   ;;  %s965_s13 = smov %s765_s14 }
 0x1c5   : > { %s966_s14 = smov %s857_s25  ;;  %s967_s15 = smov %s773_s16 }
 0x1c6   : > { %s968_s16 = smov %s970_s20  ;;  %15 = sbr.rel (!%p13_p3) target bundleno = 4 (0x4), region = 71 }
 0x1cb   :  { %486 = vsyncpa [#allocation3], 1 }
 0x1cc   :  { %488 = vsyncpa [#allocation3 + $0x1], 1 }

</bundles_post_ra>
